<compile_context>
chip_gen: v5e
topology: v5e:2x2
jax: 0.10.0
libtpu: 0.0.40
codegen_flags: <defaults>
</compile_context>

<pallas_src>
import math
import jax
import jax.numpy as jnp
from jax.experimental import pallas as pl
from jax.experimental.pallas import tpu as pltpu


# ------------------------------ tile utilities -------------------------------

def _largest_divisor_tile(n, cap, align):
    """Largest multiple of `align` that divides n and is <= cap; 0 if none."""
    t = (min(cap, n) // align) * align
    while t >= align:
        if n % t == 0:
            return t
        t -= align
    return 0


def _pick_tile(n, cap, align):
    """Tile for a dim of size n: full dim if small, else the largest aligned
    divisor <= cap (falling back to any divisor, then the full dim)."""
    if n <= cap:
        return n
    t = _largest_divisor_tile(n, cap, align)
    if t:
        return t
    t = _largest_divisor_tile(n, cap, 1)
    if t:
        return t
    return n


def _tpu_generation():
    """Best-effort ('v5e'|'v6e'|'v7x'|'unknown', vmem_capacity_bytes)."""
    kind = ""
    try:
        kind = jax.devices()[0].device_kind.lower()
    except Exception:
        pass
    vmem = None
    try:
        vmem = int(pltpu.get_tpu_info().vmem_capacity_bytes)
    except Exception:
        pass
    if "v7" in kind or "7x" in kind or (vmem is not None and vmem <= 80 * 1024 * 1024):
        return "v7x", (vmem or 64 * 1024 * 1024)
    if "v5 lite" in kind or "v5e" in kind or "v5litepod" in kind:
        return "v5e", (vmem or 128 * 1024 * 1024)
    if "v6" in kind or "trillium" in kind:
        return "v6e", (vmem or 128 * 1024 * 1024)
    return "unknown", (vmem or 128 * 1024 * 1024)


def _tile_caps(gen, itemsize):
    """Generation/dtype-aware (cap_b, cap_l, cap_j)."""
    if gen == "v7x":
        # 64 MiB VMEM per TC: f32 tiles must stay small; bf16 unlocks bigger ones.
        return (256, 1024, 512) if itemsize <= 2 else (256, 512, 256)
    if gen == "v5e":
        # 128-wide MXU already filled at M/N=128-256; prefer deep L tiles.
        return (128, 1024, 256)
    if gen == "v6e":
        return (256, 1024, 512)
    return (256, 512, 256)  # conservative default for unknown hardware


# --------------------------------- kernel ------------------------------------

def _make_kernel(w_shared, has_bias, l_axis):
    """Kernel over one (tB, tK, tL) x block and (tK|1, tL, tJ) weight block,
    accumulating in f32 VMEM scratch across the innermost L-reduction axis."""

    def kernel(*refs):
        if has_bias:
            x_ref, w_ref, b_ref, o_ref, acc_ref = refs
        else:
            x_ref, w_ref, o_ref, acc_ref = refs
            b_ref = None

        li = pl.program_id(l_axis)

        @pl.when(li == 0)
        def _init():
            acc_ref[...] = jnp.zeros_like(acc_ref)

        x_blk = x_ref[...]                                    # (tB, tK, tL)
        tb, tk, tl = x_blk.shape
        if w_shared:
            # One dense GEMM with M = tB*tK rows; reshape is a layout no-op
            # because tK is the sublane dim of the x block.
            x_flat = x_blk.reshape(tb * tk, tl)
            acc_ref[...] += jnp.dot(x_flat, w_ref[0],
                                    preferred_element_type=jnp.float32)
        else:
            # Single sublane relayout (XLU) + one batched MXU matmul over k,
            # instead of tK sublane-strided loads + tK small dots.
            x_t = jnp.transpose(x_blk, (1, 0, 2))             # (tK, tB, tL)
            acc_ref[...] += jnp.einsum(
                "kbl,klj->kbj", x_t, w_ref[...],
                preferred_element_type=jnp.float32)           # (tK, tB, tJ)

        @pl.when(li == pl.num_programs(l_axis) - 1)
        def _finalize():
            tb_o, tk_o, tj_o = o_ref.shape
            if w_shared:
                out = acc_ref[...].reshape(tb_o, tk_o, tj_o)  # layout no-op
            else:
                out = jnp.transpose(acc_ref[...], (1, 0, 2))  # (tB, tK, tJ)
            if has_bias:
                out = out + b_ref[...].astype(jnp.float32)    # (1,tK,tJ)/(1,1,tJ)
            o_ref[...] = out.astype(o_ref.dtype)              # one dense store

    return kernel


# --------------------------------- wrapper ------------------------------------

def parallel_linear(x, weight, bias=None, *, share=False, compute_dtype=None,
                    block_b=None, block_k=None, block_l=None, block_j=None):
    """x: (B, K, L); weight: (K, L, J) or (1, L, J); bias: (1,K,J)/(1,1,J)/None."""
    del share  # inferred from weight/bias shapes; kept for API parity with PyTorch
    B, K, L = x.shape
    Kw, Lw, J = weight.shape
    assert Lw == L, f"weight in_feat {Lw} != x in_feat {L}"
    w_shared = (Kw == 1)
    if not w_shared:
        assert Kw == K, f"weight n_parallel {Kw} != x n_parallel {K}"

    has_bias = bias is not None
    b_shared = True
    if has_bias:
        assert bias.shape[0] == 1 and bias.shape[-1] == J
        b_shared = (bias.shape[1] == 1)
        if not b_shared:
            assert bias.shape[1] == K

    out_dtype = x.dtype
    if compute_dtype is not None:
        # bf16 inputs halve HBM traffic / VMEM and unlock native MXU throughput;
        # accumulation stays f32 and the output keeps the caller's dtype.
        x = x.astype(compute_dtype)
        weight = weight.astype(compute_dtype)

    # ---- n_parallel (K) blocking: keep block_k <= 8 (host-pad if needed) ----
    K_pad = K
    if block_k is None:
        if K <= 8:
            block_k = K
        else:
            if K % 8 != 0:
                K_pad = ((K + 7) // 8) * 8
            block_k = 8
    else:
        assert K % block_k == 0, "explicit block_k must divide n_parallel"
    if K_pad != K:
        pad = K_pad - K
        x = jnp.pad(x, ((0, 0), (0, pad), (0, 0)))
        if not w_shared:
            weight = jnp.pad(weight, ((0, pad), (0, 0), (0, 0)))
        if has_bias and not b_shared:
            bias = jnp.pad(bias, ((0, 0), (0, pad), (0, 0)))
    assert K_pad % block_k == 0

    # ---- generation-aware tile selection ------------------------------------
    gen, vmem_cap = _tpu_generation()
    itemsize = max(jnp.dtype(x.dtype).itemsize, jnp.dtype(weight.dtype).itemsize)
    cap_b, cap_l, cap_j = _tile_caps(gen, itemsize)
    auto_b, auto_l, auto_j = block_b is None, block_l is None, block_j is None
    if auto_b:
        block_b = _pick_tile(B, cap_b, 8)
    if auto_l:
        block_l = _pick_tile(L, cap_l, 128)   # lane-aligned reduction tile
    if auto_j:
        block_j = _pick_tile(J, cap_j, 128)   # lane-dense output tile
    assert B % block_b == 0 and L % block_l == 0 and J % block_j == 0

    vmem_limit = int(min(vmem_cap * 3 // 4, 96 * 1024 * 1024))

    xbytes = jnp.dtype(x.dtype).itemsize
    wbytes = jnp.dtype(weight.dtype).itemsize
    obytes = jnp.dtype(out_dtype).itemsize
    bbytes = jnp.dtype(bias.dtype).itemsize if has_bias else 0

    def _vmem_estimate(bb, bk, bl, bj):
        x_blk = bb * bk * bl * xbytes
        w_blk = (1 if w_shared else bk) * bl * bj * wbytes
        o_blk = bb * bk * bj * obytes
        bias_blk = ((1 if b_shared else bk) * bj * bbytes) if has_bias else 0
        acc_blk = bb * bk * bj * 4
        return 2 * (x_blk + w_blk + o_blk + bias_blk) + acc_blk  # double-buffered

    budget = int(vmem_limit * 0.9)
    for _ in range(16):                    # shrink-to-fit the scoped VMEM budget
        if _vmem_estimate(block_b, block_k, block_l, block_j) <= budget:
            break
        changed = False
        if auto_l and block_l > 128:
            t = _largest_divisor_tile(L, block_l // 2, 128)
            if t and t < block_l:
                block_l, changed = t, True
        if not changed and auto_j and block_j > 128:
            t = _largest_divisor_tile(J, block_j // 2, 128)
            if t and t < block_j:
                block_j, changed = t, True
        if not changed and auto_b and block_b > 8:
            t = (_largest_divisor_tile(B, block_b // 2, 8)
                 or _largest_divisor_tile(B, block_b // 2, 1))
            if t and t < block_b:
                block_b, changed = t, True
        if not changed:
            break

    # Megacore (v7x): make sure there is >=1 parallel grid axis with >=2 blocks
    # so the second TensorCore isn't idle; negligible cost on single-core chips.
    if auto_b and B >= 2 and \
            (B // block_b) * (K_pad // block_k) * (J // block_j) == 1:
        t = (_largest_divisor_tile(B, block_b // 2, 8)
             or _largest_divisor_tile(B, block_b // 2, 1))
        if t:
            block_b = t

    grid = (B // block_b, K_pad // block_k, J // block_j, L // block_l)

    # ---- BlockSpecs (native layouts; no wrapper transposes) ------------------
    # TODO(synk): sweep pipeline_mode=pl.Buffered(3) on x/w for small-tile,
    # latency-exposed configs (skip on v7x when it would exceed the VMEM budget).
    # TODO(synk): on v7x, fold 2-4 L sub-tiles into one grid step (inner loop)
    # to let the MRB accumulate in-place and amortize per-step overhead.
    x_spec = pl.BlockSpec((block_b, block_k, block_l),
                          lambda bi, ki, ji, li: (bi, ki, li))
    if w_shared:
        # Weight stays (1, L, J) in HBM; constant leading block index.
        w_spec = pl.BlockSpec((1, block_l, block_j),
                              lambda bi, ki, ji, li: (0, li, ji))
    else:
        w_spec = pl.BlockSpec((block_k, block_l, block_j),
                              lambda bi, ki, ji, li: (ki, li, ji))
    o_spec = pl.BlockSpec((block_b, block_k, block_j),
                          lambda bi, ki, ji, li: (bi, ki, ji))

    in_specs = [x_spec, w_spec]
    args = [x, weight]
    if has_bias:
        if b_shared:
            b_spec = pl.BlockSpec((1, 1, block_j),
                                  lambda bi, ki, ji, li: (0, 0, ji))
        else:
            b_spec = pl.BlockSpec((1, block_k, block_j),
                                  lambda bi, ki, ji, li: (0, ki, ji))
        in_specs.append(b_spec)
        args.append(bias)

    if w_shared:
        acc_shape = (block_b * block_k, block_j)   # flat GEMM accumulator
    else:
        acc_shape = (block_k, block_b, block_j)    # k-major batched accumulator

    kernel = _make_kernel(w_shared, has_bias, l_axis=3)

    out = pl.pallas_call(
        kernel,
        out_shape=jax.ShapeDtypeStruct((B, K_pad, J), out_dtype),
        grid_spec=pltpu.PrefetchScalarGridSpec(
            num_scalar_prefetch=0,
            grid=grid,
            in_specs=in_specs,
            out_specs=o_spec,
            scratch_shapes=[pltpu.VMEM(acc_shape, jnp.float32)],
        ),
        compiler_params=pltpu.CompilerParams(
            # L (reduction) must stay the innermost "arbitrary" axis: the
            # accumulator init/finalize gating depends on it.
            dimension_semantics=("parallel", "parallel", "parallel", "arbitrary"),
            vmem_limit_bytes=vmem_limit,
        ),
    )(*args)

    if K_pad != K:
        out = out[:, :K, :]
    return out


def init_parallel_linear_params(key, n_parallel, in_feat, out_feat,
                                share=False, bias=True, dtype=jnp.float32):
    """Mirrors ParallelLinear.reset_parameters:
    kaiming_uniform_(weight[n].T, a=sqrt(5)) -> U(-1/sqrt(in_feat), 1/sqrt(in_feat));
    bias initialized to 0."""
    kw = 1 if share else n_parallel
    bound = 1.0 / math.sqrt(in_feat)
    w = jax.random.uniform(key, (kw, in_feat, out_feat), dtype=dtype,
                           minval=-bound, maxval=bound)
    if bias:
        b = jnp.zeros((1, 1 if share else n_parallel, out_feat), dtype=dtype)
    else:
        b = None
    return w, b


if __name__ == "__main__":
    key = jax.random.PRNGKey(0)
    keys = jax.random.split(key, 8)

    def reference(x, w, b):
        K = x.shape[1]
        w_full = jnp.broadcast_to(w, (K,) + w.shape[1:])
        out = jnp.einsum("bkl,klj->bkj", x, w_full,
                         precision=jax.lax.Precision.HIGHEST)
        if b is not None:
            out = out + jnp.broadcast_to(b, (1, K, b.shape[-1]))
        return out

    # 1) per-group weights + (non-zero) bias
    B, K, L, J = 8, 4, 32, 32
    x = jax.random.normal(keys[0], (B, K, L), dtype=jnp.float32)
    w, b = init_parallel_linear_params(keys[1], K, L, J, share=False, bias=True)
    b = b + 0.1 * jax.random.normal(keys[2], b.shape, dtype=jnp.float32)
    out = jax.block_until_ready(parallel_linear(x, w, b))
    assert out.shape == (B, K, J)
    assert jnp.allclose(out, reference(x, w, b), atol=1e-4, rtol=1e-4)

    # 2) shared weight + shared bias (share=True): single fused GEMM path
    w_s, b_s = init_parallel_linear_params(keys[1], K, L, J, share=True, bias=True)
    b_s = b_s + 0.1 * jax.random.normal(keys[2], b_s.shape, dtype=jnp.float32)
    out_s = jax.block_until_ready(parallel_linear(x, w_s, b_s, share=True))
    assert jnp.allclose(out_s, reference(x, w_s, b_s), atol=1e-4, rtol=1e-4)

    # 3) no bias: the bias array / DMA / add path is skipped entirely
    out_nb = jax.block_until_ready(parallel_linear(x, w, None))
    assert jnp.allclose(out_nb, reference(x, w, None), atol=1e-4, rtol=1e-4)

    # 4) tiled path: multiple B/K/J blocks and an L-reduction grid axis
    B2, K2, L2, J2 = 16, 16, 256, 256
    x2 = jax.random.normal(keys[3], (B2, K2, L2), dtype=jnp.float32)
    w2, b2 = init_parallel_linear_params(keys[4], K2, L2, J2, share=False, bias=True)
    b2 = b2 + 0.1 * jax.random.normal(keys[5], b2.shape, dtype=jnp.float32)
    out2 = jax.block_until_ready(
        parallel_linear(x2, w2, b2, block_b=8, block_k=8, block_l=128, block_j=128))
    assert out2.shape == (B2, K2, J2)
    assert jnp.allclose(out2, reference(x2, w2, b2), atol=1e-4, rtol=1e-4)

    # 5) n_parallel > 8 and not a multiple of 8: host-side K padding path
    B3, K3, L3, J3 = 8, 12, 128, 128
    x3 = jax.random.normal(keys[6], (B3, K3, L3), dtype=jnp.float32)
    w3, b3 = init_parallel_linear_params(keys[7], K3, L3, J3, share=False, bias=True)
    b3 = b3 + 0.1 * jax.random.normal(keys[2], b3.shape, dtype=jnp.float32)
    out3 = jax.block_until_ready(parallel_linear(x3, w3, b3))
    assert out3.shape == (B3, K3, J3)
    assert jnp.allclose(out3, reference(x3, w3, b3), atol=1e-4, rtol=1e-4)

    # 6) bf16 compute (f32 accumulation, output keeps the f32 input dtype)
    out_bf = jax.block_until_ready(
        parallel_linear(x, w, b, compute_dtype=jnp.bfloat16))
    assert out_bf.dtype == jnp.float32
    assert jnp.allclose(out_bf, reference(x, w, b), atol=3e-2, rtol=3e-2)

    print("KERNEL_OK")
</pallas_src>

<mosaic_0001>
module attributes {stable_mosaic.version = 11 : i64} {
  func.func @kernel(%arg0: i32, %arg1: i32, %arg2: i32, %arg3: i32, %arg4: memref<4x4x32xf32, #tpu.memory_space<vmem>>, %arg5: memref<4x32x32xf32, #tpu.memory_space<vmem>>, %arg6: memref<1x4x32xf32, #tpu.memory_space<vmem>>, %arg7: memref<4x4x32xf32, #tpu.memory_space<vmem>>, %arg8: memref<4x4x32xf32, #tpu.memory_space<vmem>>) attributes {dimension_semantics = [#tpu.dimension_semantics<parallel>, #tpu.dimension_semantics<parallel>, #tpu.dimension_semantics<parallel>, #tpu.dimension_semantics<arbitrary>], iteration_bounds = array<i64: 2, 1, 1, 1>, scalar_prefetch = 0 : i64, scratch_operands = 1 : i64, tpu.core_type = #tpu.core_type<tc>, window_params = [{transform_indices = @transform_0, window_bounds = array<i64: 4, 4, 32>}, {transform_indices = @transform_1, window_bounds = array<i64: 4, 32, 32>}, {transform_indices = @transform_2, window_bounds = array<i64: 1, 4, 32>}, {transform_indices = @transform_3, window_bounds = array<i64: 4, 4, 32>}]} {
    %c0_i32 = arith.constant 0 : i32
    %0 = arith.cmpi eq, %arg3, %c0_i32 : i32
    %1 = arith.extui %0 : i1 to i32
    %c0_i32_0 = arith.constant 0 : i32
    %2 = arith.cmpi ne, %1, %c0_i32_0 : i32
    scf.if %2 {
      %cst_14 = arith.constant 0.000000e+00 : f32
      %13 = vector.broadcast %cst_14 : f32 to vector<4x4x32xf32>
      %c0_15 = arith.constant 0 : index
      %c0_16 = arith.constant 0 : index
      %c0_17 = arith.constant 0 : index
      %14 = vector.load %arg8[%c0_15, %c0_16, %c0_17] : memref<4x4x32xf32, #tpu.memory_space<vmem>>, vector<4x4x32xf32>
      tpu.vector_store %arg8[%c0_15, %c0_16, %c0_17], %13 {strides = array<i32>} : memref<4x4x32xf32, #tpu.memory_space<vmem>>, vector<4x4x32xf32>,
    } else {
    }
    %c0 = arith.constant 0 : index
    %c0_1 = arith.constant 0 : index
    %c0_2 = arith.constant 0 : index
    %3 = vector.load %arg4[%c0, %c0_1, %c0_2] : memref<4x4x32xf32, #tpu.memory_space<vmem>>, vector<4x4x32xf32>
    %4 = tpu.transpose %3, [1, 0, 2] : vector<4x4x32xf32> -> vector<4x4x32xf32>
    %c0_3 = arith.constant 0 : index
    %c0_4 = arith.constant 0 : index
    %c0_5 = arith.constant 0 : index
    %5 = vector.load %arg8[%c0_3, %c0_4, %c0_5] : memref<4x4x32xf32, #tpu.memory_space<vmem>>, vector<4x4x32xf32>
    %c0_6 = arith.constant 0 : index
    %c0_7 = arith.constant 0 : index
    %c0_8 = arith.constant 0 : index
    %6 = vector.load %arg5[%c0_6, %c0_7, %c0_8] : memref<4x32x32xf32, #tpu.memory_space<vmem>>, vector<4x32x32xf32>
    "tpu.trace_start"() <{level = 10 : i32, message = "kbl,klj->kbj"}> : () -> ()
    %cst = arith.constant dense<0.000000e+00> : vector<4x4x32xf32>
    %7 = tpu.matmul %4, %6, %cst {dimension_numbers = #tpu.dot_dimension_numbers<[2], [1], [1], [2], [0, 0, 0, 1, 1, 2], [0], [0]>} : vector<4x4x32xf32>, vector<4x32x32xf32>, vector<4x4x32xf32> -> vector<4x4x32xf32>
    "tpu.trace_stop"() : () -> ()
    %8 = arith.addf %5, %7 : vector<4x4x32xf32>
    %c0_9 = arith.constant 0 : index
    %c0_10 = arith.constant 0 : index
    %c0_11 = arith.constant 0 : index
    %9 = vector.load %arg8[%c0_9, %c0_10, %c0_11] : memref<4x4x32xf32, #tpu.memory_space<vmem>>, vector<4x4x32xf32>
    tpu.vector_store %arg8[%c0_9, %c0_10, %c0_11], %8 {strides = array<i32>} : memref<4x4x32xf32, #tpu.memory_space<vmem>>, vector<4x4x32xf32>,
    %c0_i32_12 = arith.constant 0 : i32
    %10 = arith.cmpi eq, %arg3, %c0_i32_12 : i32
    %11 = arith.extui %10 : i1 to i32
    %c0_i32_13 = arith.constant 0 : i32
    %12 = arith.cmpi ne, %11, %c0_i32_13 : i32
    scf.if %12 {
      %c0_14 = arith.constant 0 : index
      %c0_15 = arith.constant 0 : index
      %c0_16 = arith.constant 0 : index
      %13 = vector.load %arg8[%c0_14, %c0_15, %c0_16] : memref<4x4x32xf32, #tpu.memory_space<vmem>>, vector<4x4x32xf32>
      %14 = tpu.transpose %13, [1, 0, 2] : vector<4x4x32xf32> -> vector<4x4x32xf32>
      %c0_17 = arith.constant 0 : index
      %c0_18 = arith.constant 0 : index
      %c0_19 = arith.constant 0 : index
      %15 = vector.load %arg6[%c0_17, %c0_18, %c0_19] : memref<1x4x32xf32, #tpu.memory_space<vmem>>, vector<1x4x32xf32>
      %16 = vector.broadcast %15 : vector<1x4x32xf32> to vector<4x4x32xf32>
      %17 = arith.addf %14, %16 : vector<4x4x32xf32>
      %c0_20 = arith.constant 0 : index
      %c0_21 = arith.constant 0 : index
      %c0_22 = arith.constant 0 : index
      %18 = vector.load %arg7[%c0_20, %c0_21, %c0_22] : memref<4x4x32xf32, #tpu.memory_space<vmem>>, vector<4x4x32xf32>
      tpu.vector_store %arg7[%c0_20, %c0_21, %c0_22], %17 {strides = array<i32>} : memref<4x4x32xf32, #tpu.memory_space<vmem>>, vector<4x4x32xf32>,
    } else {
    }
    return
  }
  func.func @transform_0(%arg0: i32, %arg1: i32, %arg2: i32, %arg3: i32) -> (i32, i32, i32) {
    %c0_i32 = arith.constant 0 : i32
    return %arg0, %arg1, %arg3 : i32, i32, i32
  }
  func.func @transform_1(%arg0: i32, %arg1: i32, %arg2: i32, %arg3: i32) -> (i32, i32, i32) {
    %c0_i32 = arith.constant 0 : i32
    return %arg1, %arg3, %arg2 : i32, i32, i32
  }
  func.func @transform_2(%arg0: i32, %arg1: i32, %arg2: i32, %arg3: i32) -> (i32, i32, i32) {
    %c0_i32 = arith.constant 0 : i32
    %c0_i32_0 = arith.constant 0 : i32
    return %c0_i32, %arg1, %arg2 : i32, i32, i32
  }
  func.func @transform_3(%arg0: i32, %arg1: i32, %arg2: i32, %arg3: i32) -> (i32, i32, i32) {
    %c0_i32 = arith.constant 0 : i32
    return %arg0, %arg1, %arg2 : i32, i32, i32
  }
}

</mosaic_0001>

<bundles_post_ra>
// kernel: tpu_custom_call.1
= control target key start
LH: loop header
LB: loop body
LE: loop exit
PB: predicated region body
PF: predicated region fallthrough
CT: control target
= control target key end

     0   :  { %s1149_s0 = inlined_call_operand.hbm [shape: f32[8,4,32], index: 0, kind: input, shape index: {}]   ;;  %s1150_s1 = inlined_call_operand.hbm [shape: f32[4,32,32], index: 1, kind: input, shape index: {}]   ;;  %s1151_s2 = inlined_call_operand.hbm [shape: f32[1,4,32], index: 2, kind: input, shape index: {}]   ;;  %s1152_s3 = inlined_call_operand.hbm [shape: f32[8,4,32], index: 3, kind: output, shape index: {}]  }
   0x1   :  { %1153 = sst [smem:[#allocation13_spill]] %s1150_s1 }
   0x2   :  { %8 = vsyncpa [#allocation4], 0 }
   0x3   :  { %10 = vsyncpa [#allocation4 + $0x1], 0 }
   0x4   :  { %11 = vsyncpa [#allocation7], 0 }
   0x5   :  { %12 = vsyncpa [#allocation5], 0 }
   0x6   :  { %14 = vsyncpa [#allocation5 + $0x1], 0  ;;  %s961_s12 = smov 0   ;;  %s963_s13 = smov 0  }
   0x7   :  { %s965_s14 = smov 0   ;;  %s967_s15 = smov 0  }
   0x8   :  { %s969_s16 = smov 0   ;;  %s971_s17 = smov 0  }
   0x9 LB: > { %s635_s18 = sadd.s32 4294967295, %s928_s17   ;;  %s636_s19 = sadd.s32 4294967294, %s928_s17   ;;  %s928_s17 = sphi %s971_s17, %s20_s17   ;;  %s924_s16 = sphi %s969_s16, %s1166_s16   ;;  %s920_s15 = sphi %s967_s15, %s1165_s15   ;;  %s916_s14 = sphi %s965_s14, %s1164_s14   ;;  %s912_s13 = sphi %s963_s13, %s1163_s13   ;;  %s908_s12 = sphi %s961_s12, %s1162_s12  }
   0xa   : > { %p70_p0 = scmp.ne.s32.totalorder %s912_s13, %s908_s12  ;;  %p995_p1 = scmp.eq.s32.totalorder %s635_s18, 0 }
   0xb   : > { %p999_p2 = scmp.eq.s32.totalorder %s635_s18, 1  ;;  %p162_p3 = scmp.eq.s32.totalorder %s636_s19, 1 }
   0xc   : > { %p1005_p4 = por %p995_p1, %p70_p0  ;;  %p637_p5 = scmp.ge.s32.totalorder %s928_s17, 1 }
   0xd   : > { %p1010_p6 = por %p162_p3, %p70_p0  ;;  %p169_p7 = scmp.lt.s32.totalorder %s928_s17, 3 }
   0xe   : > { %s1158_s1 = sld [smem:[#allocation13_spill]]  ;;  %s930_s28 = smov [#allocation6]  }
   0xf   : > { %p1018_p8 = pnand %p637_p5, %p169_p7  ;;  %s189_s29 = sshll.u32 %s930_s28, 4  ;;  %s190_s29 = int_to_ptr.vmem [resolvable:$true] %s189_s29 }
  0x10   : > { %p640_p11 = scmp.ge.s32.totalorder %s928_s17, 2  ;;  %s205_s5 = sshll.u32 %s1151_s2, 4  ;;  %s206_s5 = int_to_ptr.hbm [resolvable:$true] %s205_s5 }
  0x11   : > { %p672_p9 = pneg %p1018_p8  ;;  %s931_s6 = smov 128  }
  0x12   : > { %s932_s7 = smov 8   ;;  %s933_s8 = smov [#allocation8]  }
  0x13   : > { %p673_p10 = pnand %p672_p9, %p995_p1  ;;  %s207_s9 = sshll.u32 %s933_s8, 4  ;;  %s208_s9 = int_to_ptr.vmem [resolvable:$true] %s207_s9 }
  0x14   : > { %s187_s26 = sshll.u32 %s1158_s1, 4  ;;  %s46_s10 = sadd.s32 1, %s924_s16  ;;  %s188_s26 = int_to_ptr.hbm [resolvable:$true] %s187_s26 }
  0x15   : > { %675 = dma.hbm_to_vmem [thread:$0]  (!%p673_p10), %s188_s26, 2048, %s190_s29, [#allocation7], %s931_s6, %s931_s6, %s932_s7  }
  0x16   : > { %678 = dma.hbm_to_vmem [thread:$0]  (!%p673_p10), %s206_s5, 64, %s208_s9, [#allocation7]  }
  0x17   : > { %s57_s11 = sadd.s32 1, %s916_s14  ;;  %p48_p12 = scmp.ge.s32.totalorder %s46_s10, 2 }
  0x18   : > { %p64_p13 = scmp.ne.s32.totalorder %s916_s14, %s912_s13  ;;  %p65_p0 = scmp.eq.s32.totalorder %s928_s17, 0 }
  0x19   : > { %p689_p3 = scmp.lt.s32.totalorder %s928_s17, 2  ;;  %s1168_s10 = smov (%p48_p12, %s46_s10), 0 }
  0x1a   : > { %p1038_p5 = por %p65_p0, %p64_p13  ;;  %p1044_p7 = por %p999_p2, %p64_p13 }
  0x1b   : > { %s50_s24 = ssub.s32 %s924_s16, %s1168_s10  ;;  %s218_s25 = sand.u32 1, %s916_s14  }
  0x1c   : > { %p55_p9 = scmp.eq.s32.totalorder %s50_s24, 0  ;;  %s641_s26 = sshll.u32 %s218_s25, 4 }
  0x1d   : > { %s658_s28 = sshll.u32 %s924_s16, 4  ;;  %s222_s7 = scalar_lea.vmem [#allocation3], %s641_s26 }
  0x1e   : > { %s1053_s29 = scalar_select %p55_p9, %s916_s14, %s57_s11  }
  0x1f   : > { %s229_s5 = scalar_lea.hbm %s1149_s0, %s658_s28  ;;  %s232_s8 = sshll.u32 %s222_s7, 4  ;;  %s233_s8 = int_to_ptr.vmem [resolvable:$true] %s232_s8 }
  0x20   : > { %s230_s6 = sshll.u32 %s229_s5, 4  ;;  %p680_p2 = pnand %p689_p3, %p1038_p5  ;;  %s231_s6 = int_to_ptr.hbm [resolvable:$true] %s230_s6 }
  0x21   : > { %s219_s21 = scalar_lea.sflag [#allocation4], %s218_s25  ;;  %s934_s9 = smov 64  }
  0x22   : > { %s935_s1 = smov 4   ;;  %244 = sbr.rel (%p1018_p8) target bundleno = 221 (0xdd), region = 32 }
  0x23   : > { %682 = dma.hbm_to_vmem [thread:$0]  (!%p680_p2), %s231_s6, 256, %s233_s8, %s219_s21, %s934_s9, %s934_s9, %s935_s1  }
  0x24   : > { %s1065_s11 = sand.u32 (!%p1018_p8), 1, %s912_s13  }
  0x25   : > { %s645_s24 = sshll.u32 (!%p1018_p8), %s1065_s11, 4  ;;  %s247_s26 = scalar_lea.sflag (!%p1018_p8), [#allocation4], %s1065_s11 }
  0x26   : > { %s250_s18 = scalar_lea.vmem (!%p1018_p8), [#allocation3], %s645_s24 }
  0x27   : > { %895 = dma.done.wait (%p1005_p4), %s247_s26, 256  }
  0x28   : > { %897 = vsyncadd (%p1005_p4), %s247_s26, 4294967040 }
  0x29   : > { %899 = dma.done.wait (%p995_p1), [#allocation7], 2112  }
  0x2a   : > { %901 = vsyncadd (%p995_p1), [#allocation7], 4294965184  ;;  %vm292_vm0 = vcmask 257024   ;;  %v936_v0 = vmov 0.0   ;;  %v937_v1 = vmov 1983009808  }
  0x2b   : > { %295 = vst.msk [vmem:[#allocation2 + $0x8] sm:$0xf] %vm292_vm0, %v936_v0  ;;  %v305_v2 = vunpack.c.l.s4 %v937_v1  ;;  %v345_v3 = vld [vmem:[#allocation6 + $0x58] sm:$0xff]  ;;  %v344_v4 = vld [vmem:[#allocation6 + $0x50] sm:$0xff]  ;;  %v343_v6 = vld [vmem:[#allocation6 + $0x48] sm:$0xff]  ;;  %vm302_vm1 = vcmask 1047556  }
  0x2c   : > { %293 = vst.msk [vmem:[#allocation2] sm:$0xf] %vm292_vm0, %v936_v0  ;;  %v349_v5 = vld [vmem:[#allocation6 + $0x78] sm:$0xff]  ;;  %412 = vmatpush.msra.mxu2 %v345_v3  ;;  %v348_v7 = vld [vmem:[#allocation6 + $0x70] sm:$0xff]  ;;  %v342_v8 = vld [vmem:[#allocation6 + $0x40] sm:$0xff]  ;;  %vm350_vm2 = vcmask 261120  }
  0x2d   : > { %294 = vst.msk [vmem:[#allocation2 + $0x4] sm:$0xf] %vm292_vm0, %v936_v0  ;;  %435 = vmatpush.msra.mxu3 %v349_v5  ;;  %v347_v9 = vld [vmem:[#allocation6 + $0x68] sm:$0xff]  ;;  %v297_v10 = vld [vmem:[%s250_s18] sm:$0xf]  ;;  %v1083_v14 = vunpack.c.0.s8 %v305_v2  ;;  %v337_v15 = vld [vmem:[#allocation6 + $0x18] sm:$0xff] }
  0x2e   : > { %296 = vst.msk [vmem:[#allocation2 + $0xc] sm:$0xf] %vm292_vm0, %v936_v0  ;;  %v298_v11 = vld [vmem:[%s250_s18 + $0x4] sm:$0xf]  ;;  %413 = vmatpush.msra.mxu2 %v344_v4  ;;  %v299_v12 = vld [vmem:[%s250_s18 + $0x8] sm:$0xf]  ;;  %366 = vmatpush.msra.mxu0 %v337_v15 }
  0x2f   : > { %436 = vmatpush.msra.mxu3 %v348_v7  ;;  %v300_v13 = vld [vmem:[%s250_s18 + $0xc] sm:$0xf]  ;;  %v301_v16 = vrot.slane %v299_v12, 4  ;;  %v938_v18 = vmov 1934713408   ;;  %v346_v20 = vld [vmem:[#allocation6 + $0x60] sm:$0xff] }
  0x30   : > { %v308_v17 = vrot.slane %v300_v13, 4  ;;  %v319_v19 = vunpack.c.l.s4 %v938_v18  ;;  %v336_v21 = vld [vmem:[#allocation6 + $0x10] sm:$0xff]  ;;  %v341_v22 = vld [vmem:[#allocation6 + $0x38] sm:$0xff]  ;;  %414 = vmatpush.msra.mxu2 %v343_v6  ;;  %v335_v23 = vld [vmem:[#allocation6 + $0x8] sm:$0xff]  ;;  %s659_s1 = sshll.u32 %s920_s15, 4  ;;  %s283_s25 = scalar_lea.vmem [#allocation9], %s645_s24 }
  0x31   : > { %437 = vmatpush.msra.mxu3 %v347_v9  ;;  %v340_v24 = vld [vmem:[#allocation6 + $0x30] sm:$0xff]  ;;  %v303_v25 = vsel %vm302_vm1, %v301_v16, %v297_v10  ;;  %367 = vmatpush.msra.mxu0 %v336_v21  ;;  %v334_v29 = vld [vmem:[#allocation6] sm:$0xff]  ;;  %v339_v30 = vld [vmem:[#allocation6 + $0x28] sm:$0xff]  ;;  %s510_s27 = scalar_lea.hbm %s1152_s3, %s659_s1  ;;  %s511_s28 = sshll.u32 %s283_s25, 4  ;;  %s512_s28 = int_to_ptr.vmem [resolvable:$true] %s511_s28 }
  0x32   : > { %v309_v26 = vsel %vm302_vm1, %v308_v17, %v298_v11  ;;  %389 = vmatpush.msra.mxu1 %v341_v22  ;;  %415 = vmatpush.msra.mxu2 %v342_v8  ;;  %v307_v27 = vperm.slane %v303_v25, %v1083_v14  ;;  %v320_v31 = vunpack.c.0.s8 %v319_v19  ;;  %v338_v34 = vld [vmem:[#allocation6 + $0x20] sm:$0xff]  ;;  %v332_v48 = vld [vmem:[#allocation2 + $0x8] sm:$0xf]  ;;  %s513_s30 = sshll.u32 %s510_s27, 4  ;;  %s497_s15 = scalar_lea.sflag [#allocation5], %s1065_s11  ;;  %s514_s30 = int_to_ptr.hbm [resolvable:$true] %s513_s30 }
  0x33   : > { %v313_v28 = vperm.slane %v309_v26, %v1083_v14  ;;  %438 = vmatpush.msra.mxu3 %v346_v20  ;;  %368 = vmatpush.msra.mxu0 %v335_v23  ;;  %v330_v43 = vld [vmem:[#allocation2] sm:$0xf]  ;;  %v487_v4 = vld [vmem:[#allocation8] sm:$0xf]  ;;  %s856_s4 = sshra.s32 %s514_s30, 4  ;;  %s862_s8 = scalar_lea.hbm %s1152_s3, 32  ;;  %s857_s4 = int_to_ptr.hbm [resolvable:$true] %s856_s4 }
  0x34   : > { %390 = vmatpush.msra.mxu1 %v340_v24  ;;  %v316_v32 = vrot.slane %v307_v27, 4  ;;  %v331_v46 = vld [vmem:[#allocation2 + $0x4] sm:$0xf]  ;;  %s858_s5 = scalar_lea.hbm %s857_s4, 16  ;;  %p863_p10 = scmp.lt.s32.totalorder %s857_s4, %s1152_s3 }
  0x35   : > { %v314_v33 = vrot.slane %v313_v28, 4  ;;  %369 = vmatpush.msra.mxu0 %v334_v29  ;;  %v333_v52 = vld [vmem:[#allocation2 + $0xc] sm:$0xf]  ;;  %p859_p1 = scmp.ne.s32.totalorder %s857_s4, %s858_s5  ;;  %p864_p12 = scmp.lt.s32.totalorder %s862_s8, %s858_s5 }
  0x36   : > { %391 = vmatpush.msra.mxu1 %v339_v30  ;;  %v317_v35 = vsel %vm302_vm1, %v313_v28, %v316_v32 }
  0x37   : > { %v315_v36 = vsel %vm302_vm1, %v314_v33, %v307_v27  ;;  %v325_v37 = vperm.slane %v317_v35, %v320_v31  ;;  %p860_p4 = pnand %p859_p1, %p1044_p7  ;;  %p865_p13 = por %p864_p12, %p863_p10 }
  0x38   : > { %v321_v38 = vperm.slane %v315_v36, %v320_v31  ;;  %392 = vmatpush.msra.mxu1 %v338_v34 }
  0x39   : > { %651 = vmatmul.msk.f32.vlgmr.msra.gmra.mxu2 %vm350_vm2, %v325_v37  ;;  %v328_v39 = vrot.slane %v325_v37, 4  ;;  %p861_p8 = pneg %p860_p4 }
  0x3a   : > { %649 = vmatmul.msk.f32.vlgmr.msra.gmra.mxu0 %vm350_vm2, %v321_v38  ;;  %v326_v40 = vrot.slane %v321_v38, 4 }
  0x3b   : > { %v329_v41 = vsel %vm302_vm1, 0.0, %v328_v39  ;;  %p866_p0 = pnand %p865_p13, %p861_p8 }
  0x3c   : > { %v327_v42 = vsel %vm302_vm1, 0.0, %v326_v40  ;;  %652 = vmatmul.msk.f32.vlgmr.msra.gmra.mxu3 %vm350_vm2, %v329_v41 }
  0x3d   : > { %650 = vmatmul.msk.f32.vlgmr.msra.gmra.mxu1 %vm350_vm2, %v327_v42 }
  0xb7   : > { %v371_v44 = vpop.f32.mrf.mxu0 }
  0xb8   : > { %v443_v45 = vadd.f32 %v371_v44, %v330_v43 }
  0xba   : > { %448 = vst.msk [vmem:[#allocation2] sm:$0xf] %vm292_vm0, %v443_v45  ;;  %v394_v47 = vpop.f32.mrf.mxu1 }
  0xbb   : > { %v444_v49 = vadd.f32 %v394_v47, %v331_v46 }
  0xbc   : > { %v417_v50 = vpop.f32.mrf.mxu2 }
  0xbd   : > { %449 = vst.msk [vmem:[#allocation2 + $0x4] sm:$0xf] %vm292_vm0, %v444_v49  ;;  %v445_v51 = vadd.f32 %v417_v50, %v332_v48 }
  0xbf   : > { %450 = vst.msk [vmem:[#allocation2 + $0x8] sm:$0xf] %vm292_vm0, %v445_v51  ;;  %v440_v53 = vpop.f32.mrf.mxu3 }
  0xc0   : > { %v446_v54 = vadd.f32 %v440_v53, %v333_v52 }
  0xc1   : > { %v455_v56 = vld [vmem:[#allocation2] sm:$0xf] }
  0xc2   : > { %451 = vst.msk [vmem:[#allocation2 + $0xc] sm:$0xf] %vm292_vm0, %v446_v54 }
  0xc4   : > { %v456_v59 = vld [vmem:[#allocation2 + $0x4] sm:$0xf] }
  0xc6   : > { %v457_v55 = vld [vmem:[#allocation2 + $0x8] sm:$0xf] }
  0xc7   : > { %v459_v57 = vrot.slane %v457_v55, 4 }
  0xc9   : > { %v458_v58 = vld [vmem:[#allocation2 + $0xc] sm:$0xf]  ;;  %v460_v60 = vsel %vm302_vm1, %v459_v57, %v455_v56 }
  0xca   : > { %v465_v61 = vrot.slane %v458_v58, 4  ;;  %v464_v62 = vperm.slane %v460_v60, %v1083_v14 }
  0xcc   : > { %v466_v63 = vsel %vm302_vm1, %v465_v61, %v456_v59  ;;  %v473_v0 = vrot.slane %v464_v62, 4 }
  0xcd   : > { %v470_v1 = vperm.slane %v466_v63, %v1083_v14 }
  0xcf   : > { %v471_v2 = vrot.slane %v470_v1, 4  ;;  %v474_v3 = vsel %vm302_vm1, %v470_v1, %v473_v0 }
  0xd0   : > { %v482_v5 = vperm.slane %v474_v3, %v320_v31 }
  0xd1   : > { %v472_v6 = vsel %vm302_vm1, %v471_v2, %v464_v62 }
  0xd2   : > { %v478_v7 = vperm.slane %v472_v6, %v320_v31  ;;  %v485_v8 = vrot.slane %v482_v5, 4  ;;  %v490_v9 = vadd.f32 %v487_v4, %v482_v5 }
  0xd4   : > { %v483_v10 = vrot.slane %v478_v7, 4  ;;  %v486_v11 = vsel %vm302_vm1, 0.0, %v485_v8  ;;  %v488_v12 = vadd.f32 %v487_v4, %v478_v7  ;;  %494 = vst.msk [vmem:[%s283_s25 + $0x8] sm:$0xf] %vm292_vm0, %v490_v9 }
  0xd5   : > { %v491_v13 = vadd.f32 %v487_v4, %v486_v11 }
  0xd6   : > { %v484_v14 = vsel %vm302_vm1, 0.0, %v483_v10  ;;  %492 = vst.msk [vmem:[%s283_s25] sm:$0xf] %vm292_vm0, %v488_v12 }
  0xd7   : > { %v489_v15 = vadd.f32 %v487_v4, %v484_v14  ;;  %495 = vst.msk [vmem:[%s283_s25 + $0xc] sm:$0xf] %vm292_vm0, %v491_v13 }
  0xd9   : > { %493 = vst.msk [vmem:[%s283_s25 + $0x4] sm:$0xf] %vm292_vm0, %v489_v15 }
  0xda   : > { %869 = shalt.err (!%p866_p0)
}
  0xdb   : > { %s939_s11 = smov 64   ;;  %s940_s24 = smov 4  }
  0xdc   : > { %670 = dma.vmem_to_hbm [thread:$0]  (%p1044_p7), %s512_s28, 256, %s514_s30, %s497_s15, %s939_s11, %s939_s11, %s940_s24  }
  0xdd PF: > { %s528_s26 = sand.u32 1, %s908_s12   ;;  %p684_p3 = pnand %p640_p11, %p1010_p6 }
  0xde   : > { %s529_s18 = scalar_lea.sflag [#allocation5], %s528_s26 }
  0xdf   : > { %p685_p5 = pneg %p684_p3 }
  0xe1   : > { %903 = dma.done.wait (%p685_p5), %s529_s18, 256  }
  0xe2   : > { %905 = vsyncadd (%p685_p5), %s529_s18, 4294967040  ;;  %s20_s17 = sadd.s32 1, %s928_s17   ;;  %s1162_s12 = smov %s912_s13 }
  0xe3   : > { %p17_p9 = scmp.ge.s32.totalorder %s20_s17, 4   ;;  %s1163_s13 = smov %s916_s14 }
  0xe4   : > { %s1164_s14 = smov %s1053_s29  ;;  %s1165_s15 = smov %s924_s16 }
  0xe5   : > { %s1166_s16 = smov %s1168_s10  ;;  %19 = sbr.rel (!%p17_p9) target bundleno = 9 (0x9), region = 95 }
  0xea   :  { %535 = vsyncpa [#allocation4], 1 }
  0xeb   :  { %537 = vsyncpa [#allocation4 + $0x1], 1 }
  0xec   :  { %538 = vsyncpa [#allocation7], 1 }
  0xed   :  { %539 = vsyncpa [#allocation5], 1 }
  0xee   :  { %541 = vsyncpa [#allocation5 + $0x1], 1 }

</bundles_post_ra>
